<compile_context>
chip_gen: v7x
topology: tpu7x:2x2x1
jax: 0.10.0
libtpu: 0.0.40
codegen_flags: <defaults>
</compile_context>

<pallas_src>
import functools

import jax
import jax.numpy as jnp
from jax.experimental import pallas as pl
from jax.experimental.pallas import tpu as pltpu

HIDDEN_DIM = 100
HIDDEN_PAD = 128                 # lane-aligned hidden dimension
MAX_TILE_B = 4096                # batch (sublane) tile cap; keeps VMEM ~16 MiB
_TILE_CANDIDATES = (512, 1024, 2048, 4096)
_STEP_OVERHEAD_ROWS = 2048       # ~0.35us/grid-step expressed in per-row MXU work


# -----------------------------------------------------------------------------
# Kernel
# -----------------------------------------------------------------------------
def _residual_mlp_kernel(x_ref, w1_ref, b1_ref, w2_ref, b2_ref, w3_ref, b3_ref,
                         o_ref, *, bf16_hidden):
    """One (tb, D) batch tile; whole 3-layer MLP + residual add in VMEM.

    x_ref : (tb, D_in)  f32       w1_ref: (D_in, H)  bf16    b1_ref: (1, H)     f32
    w2_ref: (H, H)      bf16      b2_ref: (1, H)     f32
    w3_ref: (H, D_out)  bf16      b3_ref: (1, D_out) f32
    o_ref : (tb, D_out) f32
    """
    x = x_ref[...]                                   # (tb, D_in) f32, kept for residual
    xb = x.astype(jnp.bfloat16)

    if bf16_hidden:
        # v6e / v7x: bf16 VPU — bias add + ReLU in bf16, result feeds the next
        # MXU dot directly (no separate f32->bf16 cast passes over (tb, H)).
        h1 = jnp.dot(xb, w1_ref[...], preferred_element_type=jnp.bfloat16)
        h1 = jnp.maximum(h1 + b1_ref[...].astype(jnp.bfloat16), 0.0)
        h2 = jnp.dot(h1, w2_ref[...], preferred_element_type=jnp.bfloat16)
        h2 = jnp.maximum(h2 + b2_ref[...].astype(jnp.bfloat16), 0.0)
    else:
        # v5e (no bf16 VALU): keep elementwise math in f32, cast for the MXU only.
        h1 = jnp.dot(xb, w1_ref[...], preferred_element_type=jnp.float32) + b1_ref[...]
        h1 = jnp.maximum(h1, 0.0).astype(jnp.bfloat16)
        h2 = jnp.dot(h1, w2_ref[...], preferred_element_type=jnp.float32) + b2_ref[...]
        h2 = jnp.maximum(h2, 0.0).astype(jnp.bfloat16)

    res = jnp.dot(h2, w3_ref[...], preferred_element_type=jnp.float32) + b3_ref[...]
    o_ref[...] = (x + res).astype(o_ref.dtype)       # next_state = x + residual


# -----------------------------------------------------------------------------
# Tiling / chip heuristics
# -----------------------------------------------------------------------------
def _round_up(a, m):
    return (a + m - 1) // m * m


def _cdiv(a, b):
    return (a + b - 1) // b


def _tpu_generation():
    """Best-effort chip-generation detection; affects perf knobs only, never
    correctness (the f32 elementwise path is valid on every generation)."""
    try:
        kind = jax.devices()[0].device_kind.lower()
    except Exception:
        return 0
    for gen in (7, 6, 5, 4, 3, 2):
        if f"v{gen}" in kind or f"tpu{gen}" in kind:
            return gen
    return 0


def _choose_batch_tiling(b, num_cores):
    """Return (tile_b, padded_b).

    Large tiles amortize the ~0.35us per-grid-step overhead, >=2 tiles let the
    'parallel' batch axis shard across v7x's 2 TensorCores, and the candidate
    set (powers of two, exact single tile, exact 2-way split) keeps batch
    padding waste low at unlucky batch sizes.
    """
    b = max(int(b), 1)
    full = _round_up(b, 8)
    cands = set(t for t in _TILE_CANDIDATES if t <= full)
    if full <= MAX_TILE_B:
        cands.add(full)                                    # exact single tile
        cands.add(min(_round_up(_cdiv(b, 2), 8), full))    # exact 2-way split
    best = None
    for tb in sorted(cands):
        b_pad = _round_up(b, tb)
        n_tiles = b_pad // tb
        steps_per_core = _cdiv(n_tiles, max(num_cores, 1))
        cost = steps_per_core * (tb + _STEP_OVERHEAD_ROWS)
        if best is None or cost < best[0] or (cost == best[0] and tb > best[1]):
            best = (cost, tb, b_pad)
    return best[1], best[2]


# -----------------------------------------------------------------------------
# Wrapper
# -----------------------------------------------------------------------------
def residual_dynamics_forward(x, prepared_params):
    """x: (..., input_dim) float32. Returns next_state of the same shape."""
    w1t, b1, w2t, b2, w3t, b3 = prepared_params
    d_in, h = w1t.shape
    d_out = w3t.shape[1]
    assert d_in == d_out, "residual add requires input_dim == output_dim"

    orig_shape = x.shape
    assert orig_shape[-1] == d_in
    x2d = x.reshape(-1, d_in).astype(jnp.float32)
    b = x2d.shape[0]

    gen = _tpu_generation()
    num_cores = 2 if gen >= 7 else 1        # v7x: 2 TCs/chip share the grid
    bf16_hidden = gen >= 6                  # bf16 VPU on v6e/v7x; f32 elsewhere

    tb, b_pad = _choose_batch_tiling(b, num_cores)
    if b_pad != b:
        x2d = jnp.pad(x2d, ((0, b_pad - b), (0, 0)))      # zero-padding is exact

    kernel = functools.partial(_residual_mlp_kernel, bf16_hidden=bf16_hidden)

    out = pl.pallas_call(
        kernel,
        out_shape=jax.ShapeDtypeStruct((b_pad, d_out), jnp.float32),
        grid_spec=pltpu.PrefetchScalarGridSpec(
            num_scalar_prefetch=0,
            grid=(b_pad // tb,),
            in_specs=[
                pl.BlockSpec((tb, d_in), lambda i: (i, 0)),    # x tile (streamed)
                pl.BlockSpec((d_in, h), lambda i: (0, 0)),     # W1^T (resident)
                pl.BlockSpec((1, h), lambda i: (0, 0)),        # b1
                pl.BlockSpec((h, h), lambda i: (0, 0)),        # W2^T
                pl.BlockSpec((1, h), lambda i: (0, 0)),        # b2
                pl.BlockSpec((h, d_out), lambda i: (0, 0)),    # W3^T
                pl.BlockSpec((1, d_out), lambda i: (0, 0)),    # b3
            ],
            out_specs=pl.BlockSpec((tb, d_out), lambda i: (i, 0)),
        ),
        compiler_params=pltpu.CompilerParams(
            dimension_semantics=("parallel",),   # shards batch tiles across TCs on v7x
            vmem_limit_bytes=32 * 1024 * 1024,
        ),
    )(x2d, w1t, b1, w2t, b2, w3t, b3)

    if b_pad != b:
        out = out[:b]
    return out.reshape(orig_shape[:-1] + (d_out,))


# -----------------------------------------------------------------------------
# Parameters
# -----------------------------------------------------------------------------
def init_params(key, input_dim, output_dim, hidden_dim=HIDDEN_DIM):
    """nn.Linear-style params: weights (out, in), biases (out,), all f32."""
    k1, k2, k3, k4, k5, k6 = jax.random.split(key, 6)
    s1 = 1.0 / jnp.sqrt(jnp.float32(input_dim))
    s2 = 1.0 / jnp.sqrt(jnp.float32(hidden_dim))
    w1 = jax.random.uniform(k1, (hidden_dim, input_dim), jnp.float32, -s1, s1)
    b1 = jax.random.uniform(k2, (hidden_dim,), jnp.float32, -s1, s1)
    w2 = jax.random.uniform(k3, (hidden_dim, hidden_dim), jnp.float32, -s2, s2)
    b2 = jax.random.uniform(k4, (hidden_dim,), jnp.float32, -s2, s2)
    w3 = jax.random.uniform(k5, (output_dim, hidden_dim), jnp.float32, -s2, s2)
    b3 = jax.random.uniform(k6, (output_dim,), jnp.float32, -s2, s2)
    return (w1, b1, w2, b2, w3, b3)


def prepare_params(params, hidden_pad=HIDDEN_PAD):
    """Transpose weights to (in, out), pad hidden 100->128 (exact), cast to bf16."""
    w1, b1, w2, b2, w3, b3 = params
    h = w1.shape[0]
    d_out = w3.shape[0]
    ph = hidden_pad - h
    w1t = jnp.pad(w1.T, ((0, 0), (0, ph))).astype(jnp.bfloat16)        # (D_in, Hp)
    b1p = jnp.pad(b1, (0, ph)).reshape(1, hidden_pad).astype(jnp.float32)
    w2t = jnp.pad(w2.T, ((0, ph), (0, ph))).astype(jnp.bfloat16)       # (Hp, Hp)
    b2p = jnp.pad(b2, (0, ph)).reshape(1, hidden_pad).astype(jnp.float32)
    w3t = jnp.pad(w3.T, ((0, ph), (0, 0))).astype(jnp.bfloat16)        # (Hp, D_out)
    b3p = b3.reshape(1, d_out).astype(jnp.float32)
    return (w1t, b1p, w2t, b2p, w3t, b3p)


def _reference_forward(x, params):
    """Pure-JAX f32 reference matching the PyTorch module."""
    w1, b1, w2, b2, w3, b3 = params
    h1 = jnp.maximum(x @ w1.T + b1, 0.0)
    h2 = jnp.maximum(h1 @ w2.T + b2, 0.0)
    return x + (h2 @ w3.T + b3)


if __name__ == "__main__":
    # torch.add(x, residual) requires input_dim == output_dim.
    input_dim = 16
    output_dim = 16

    key = jax.random.PRNGKey(0)
    kx, kp = jax.random.split(key)
    # (..., state_dim) input with leading batch dims, like the PyTorch module.
    x = jax.random.normal(kx, (4, 8, input_dim), jnp.float32)

    params = init_params(kp, input_dim, output_dim)
    prepared = prepare_params(params)

    fwd = jax.jit(lambda xx: residual_dynamics_forward(xx, prepared))
    out = jax.block_until_ready(fwd(x))

    ref = _reference_forward(x, params)
    assert out.shape == x.shape
    # bf16 MXU operands (and bf16 bias/ReLU on v6e/v7x) with f32 accumulation ->
    # deliberate ~1e-2-level precision tradeoff vs the f32 reference.
    assert jnp.allclose(out, ref, atol=3e-2, rtol=2e-2), float(jnp.max(jnp.abs(out - ref)))

    print("KERNEL_OK")
</pallas_src>

<mosaic_0001>
module attributes {stable_mosaic.version = 11 : i64} {
  func.func @_residual_mlp_kernel(%arg0: i32, %arg1: memref<32x16xf32, #tpu.memory_space<vmem>>, %arg2: memref<16x128xbf16, #tpu.memory_space<vmem>>, %arg3: memref<1x128xf32, #tpu.memory_space<vmem>>, %arg4: memref<128x128xbf16, #tpu.memory_space<vmem>>, %arg5: memref<1x128xf32, #tpu.memory_space<vmem>>, %arg6: memref<128x16xbf16, #tpu.memory_space<vmem>>, %arg7: memref<1x16xf32, #tpu.memory_space<vmem>>, %arg8: memref<32x16xf32, #tpu.memory_space<vmem>>) attributes {dimension_semantics = [#tpu.dimension_semantics<parallel>], iteration_bounds = array<i64: 1>, scalar_prefetch = 0 : i64, scratch_operands = 0 : i64, tpu.core_type = #tpu.core_type<tc>, window_params = [{transform_indices = @transform_0, window_bounds = array<i64: 32, 16>}, {pipeline_mode = #tpu.pipeline_mode<synchronous>, transform_indices = @transform_1, window_bounds = array<i64: 16, 128>}, {pipeline_mode = #tpu.pipeline_mode<synchronous>, transform_indices = @transform_2, window_bounds = array<i64: 1, 128>}, {pipeline_mode = #tpu.pipeline_mode<synchronous>, transform_indices = @transform_3, window_bounds = array<i64: 128, 128>}, {pipeline_mode = #tpu.pipeline_mode<synchronous>, transform_indices = @transform_4, window_bounds = array<i64: 1, 128>}, {pipeline_mode = #tpu.pipeline_mode<synchronous>, transform_indices = @transform_5, window_bounds = array<i64: 128, 16>}, {pipeline_mode = #tpu.pipeline_mode<synchronous>, transform_indices = @transform_6, window_bounds = array<i64: 1, 16>}, {transform_indices = @transform_7, window_bounds = array<i64: 32, 16>}]} {
    %c0 = arith.constant 0 : index
    %c0_0 = arith.constant 0 : index
    %0 = vector.load %arg1[%c0, %c0_0] : memref<32x16xf32, #tpu.memory_space<vmem>>, vector<32x16xf32>
    %1 = arith.truncf %0 : vector<32x16xf32> to vector<32x16xbf16>
    %c0_1 = arith.constant 0 : index
    %c0_2 = arith.constant 0 : index
    %2 = vector.load %arg2[%c0_1, %c0_2] : memref<16x128xbf16, #tpu.memory_space<vmem>>, vector<16x128xbf16>
    %cst = arith.constant dense<0.000000e+00> : vector<32x128xf32>
    %3 = tpu.matmul %1, %2, %cst {dimension_numbers = #tpu.dot_dimension_numbers<[1], [0], [0], [1], [0, 0, 1, 1], [], []>} : vector<32x16xbf16>, vector<16x128xbf16>, vector<32x128xf32> -> vector<32x128xf32>
    %c0_3 = arith.constant 0 : index
    %c0_4 = arith.constant 0 : index
    %4 = vector.load %arg3[%c0_3, %c0_4] : memref<1x128xf32, #tpu.memory_space<vmem>>, vector<1x128xf32>
    %5 = vector.broadcast %4 : vector<1x128xf32> to vector<32x128xf32>
    %6 = arith.addf %3, %5 : vector<32x128xf32>
    %cst_5 = arith.constant 0.000000e+00 : f32
    %7 = vector.broadcast %cst_5 : f32 to vector<32x128xf32>
    %8 = arith.maximumf %6, %7 : vector<32x128xf32>
    %9 = arith.truncf %8 : vector<32x128xf32> to vector<32x128xbf16>
    %c0_6 = arith.constant 0 : index
    %c0_7 = arith.constant 0 : index
    %10 = vector.load %arg4[%c0_6, %c0_7] : memref<128x128xbf16, #tpu.memory_space<vmem>>, vector<128x128xbf16>
    %cst_8 = arith.constant dense<0.000000e+00> : vector<32x128xf32>
    %11 = tpu.matmul %9, %10, %cst_8 {dimension_numbers = #tpu.dot_dimension_numbers<[1], [0], [0], [1], [0, 0, 1, 1], [], []>} : vector<32x128xbf16>, vector<128x128xbf16>, vector<32x128xf32> -> vector<32x128xf32>
    %c0_9 = arith.constant 0 : index
    %c0_10 = arith.constant 0 : index
    %12 = vector.load %arg5[%c0_9, %c0_10] : memref<1x128xf32, #tpu.memory_space<vmem>>, vector<1x128xf32>
    %13 = vector.broadcast %12 : vector<1x128xf32> to vector<32x128xf32>
    %14 = arith.addf %11, %13 : vector<32x128xf32>
    %cst_11 = arith.constant 0.000000e+00 : f32
    %15 = vector.broadcast %cst_11 : f32 to vector<32x128xf32>
    %16 = arith.maximumf %14, %15 : vector<32x128xf32>
    %17 = arith.truncf %16 : vector<32x128xf32> to vector<32x128xbf16>
    %c0_12 = arith.constant 0 : index
    %c0_13 = arith.constant 0 : index
    %18 = vector.load %arg6[%c0_12, %c0_13] : memref<128x16xbf16, #tpu.memory_space<vmem>>, vector<128x16xbf16>
    %cst_14 = arith.constant dense<0.000000e+00> : vector<32x16xf32>
    %19 = tpu.matmul %17, %18, %cst_14 {dimension_numbers = #tpu.dot_dimension_numbers<[1], [0], [0], [1], [0, 0, 1, 1], [], []>} : vector<32x128xbf16>, vector<128x16xbf16>, vector<32x16xf32> -> vector<32x16xf32>
    %c0_15 = arith.constant 0 : index
    %c0_16 = arith.constant 0 : index
    %20 = vector.load %arg7[%c0_15, %c0_16] : memref<1x16xf32, #tpu.memory_space<vmem>>, vector<1x16xf32>
    %21 = vector.broadcast %20 : vector<1x16xf32> to vector<32x16xf32>
    %22 = arith.addf %19, %21 : vector<32x16xf32>
    %23 = arith.addf %0, %22 : vector<32x16xf32>
    %c0_17 = arith.constant 0 : index
    %c0_18 = arith.constant 0 : index
    %24 = vector.load %arg8[%c0_17, %c0_18] : memref<32x16xf32, #tpu.memory_space<vmem>>, vector<32x16xf32>
    tpu.vector_store %arg8[%c0_17, %c0_18], %23 {strides = array<i32>} : memref<32x16xf32, #tpu.memory_space<vmem>>, vector<32x16xf32>,
    return
  }
  func.func @transform_0(%arg0: i32) -> (i32, i32) {
    %c0_i32 = arith.constant 0 : i32
    %c0_i32_0 = arith.constant 0 : i32
    return %arg0, %c0_i32 : i32, i32
  }
  func.func @transform_1(%arg0: i32) -> (i32, i32) {
    %c0_i32 = arith.constant 0 : i32
    %c0_i32_0 = arith.constant 0 : i32
    %c0_i32_1 = arith.constant 0 : i32
    return %c0_i32, %c0_i32_0 : i32, i32
  }
  func.func @transform_2(%arg0: i32) -> (i32, i32) {
    %c0_i32 = arith.constant 0 : i32
    %c0_i32_0 = arith.constant 0 : i32
    %c0_i32_1 = arith.constant 0 : i32
    return %c0_i32, %c0_i32_0 : i32, i32
  }
  func.func @transform_3(%arg0: i32) -> (i32, i32) {
    %c0_i32 = arith.constant 0 : i32
    %c0_i32_0 = arith.constant 0 : i32
    %c0_i32_1 = arith.constant 0 : i32
    return %c0_i32, %c0_i32_0 : i32, i32
  }
  func.func @transform_4(%arg0: i32) -> (i32, i32) {
    %c0_i32 = arith.constant 0 : i32
    %c0_i32_0 = arith.constant 0 : i32
    %c0_i32_1 = arith.constant 0 : i32
    return %c0_i32, %c0_i32_0 : i32, i32
  }
  func.func @transform_5(%arg0: i32) -> (i32, i32) {
    %c0_i32 = arith.constant 0 : i32
    %c0_i32_0 = arith.constant 0 : i32
    %c0_i32_1 = arith.constant 0 : i32
    return %c0_i32, %c0_i32_0 : i32, i32
  }
  func.func @transform_6(%arg0: i32) -> (i32, i32) {
    %c0_i32 = arith.constant 0 : i32
    %c0_i32_0 = arith.constant 0 : i32
    %c0_i32_1 = arith.constant 0 : i32
    return %c0_i32, %c0_i32_0 : i32, i32
  }
  func.func @transform_7(%arg0: i32) -> (i32, i32) {
    %c0_i32 = arith.constant 0 : i32
    %c0_i32_0 = arith.constant 0 : i32
    return %arg0, %c0_i32 : i32, i32
  }
}

</mosaic_0001>

<bundles_post_ra>
// kernel: _lambda_.1
= control target key start
LH: loop header
LB: loop body
LE: loop exit
PB: predicated region body
PF: predicated region fallthrough
CT: control target
= control target key end

     0   :  { %12 = vsyncpa [#allocation3], 0  ;;  %s776_s0 = inlined_call_operand.hbm [shape: f32[32,16], index: 0, kind: input, shape index: {}]   ;;  %s777_s1 = inlined_call_operand.vmem [shape: bf16[16,128], index: 1, kind: input, shape index: {}]   ;;  %s778_s2 = inlined_call_operand.vmem [shape: f32[1,128], index: 2, kind: input, shape index: {}]   ;;  %s779_s3 = inlined_call_operand.hbm [shape: bf16[128,128], index: 3, kind: input, shape index: {}]   ;;  %s780_s4 = inlined_call_operand.vmem [shape: f32[1,128], index: 4, kind: input, shape index: {}]   ;;  %s781_s5 = inlined_call_operand.hbm [shape: bf16[128,16], index: 5, kind: input, shape index: {}]   ;;  %s782_s6 = inlined_call_operand.vmem [shape: f32[1,16], index: 6, kind: input, shape index: {}]   ;;  %s783_s7 = inlined_call_operand.hbm [shape: f32[32,16], index: 7, kind: output, shape index: {}]  }
   0x1   :  { %13 = vsyncpa [#allocation6], 0 }
   0x2   :  { %14 = vsyncpa [#allocation4], 0  ;;  %s634_s24 = smov [#allocation5]   ;;  %s540_s28 = scalar_lea.hbm %s779_s3, 1024 }
   0x3   :  { %s36_s25 = sshll.u32 %s634_s24, 4  ;;  %p541_p0 = scmp.ne.s32.totalorder %s779_s3, %s540_s28  ;;  %s37_s25 = int_to_ptr.vmem [resolvable:$true] %s36_s25 }
   0x4   :  { %p544_p1 = scmp.lt.u32.totalorder %s540_s28, %s779_s3 }
   0x6   :  { %p546_p2 = pnand %p544_p1, %p541_p0 }
   0x8   :  { %549 = shalt.err (!%p546_p2)
}
   0x9   :  { %s550_s10 = scalar_lea.vmem %s37_s25, 1024  ;;  %p555_p4 = scmp.lt.s32.totalorder %s37_s25, %s37_s25 }
   0xa   :  { %p551_p3 = scmp.ne.s32.totalorder %s37_s25, %s550_s10  ;;  %p556_p5 = scmp.lt.s32.totalorder %s550_s10, %s550_s10 }
   0xc   :  { %p557_p6 = por %p556_p5, %p555_p4 }
   0xe   :  { %p558_p7 = pnand %p557_p6, %p551_p3 }
  0x10   :  { %561 = shalt.err (!%p558_p7)
}
  0x11   :  { %s635_s11 = smov 64   ;;  %s636_s12 = smov 4  }
  0x12   :  { %42 = dma.hbm_to_vmem [thread:$0]  %s779_s3, 1024, %s37_s25, [#allocation6], %s635_s11, %s635_s11, %s636_s12  }
  0x13   :  { %s637_s15 = smov [#allocation2]   ;;  %s562_s19 = scalar_lea.hbm %s776_s0, 512 }
  0x14   :  { %s20_s16 = sshll.u32 %s637_s15, 4  ;;  %p563_p8 = scmp.ne.s32.totalorder %s776_s0, %s562_s19  ;;  %s21_s16 = int_to_ptr.vmem [resolvable:$true] %s20_s16 }
  0x15   :  { %p566_p9 = scmp.lt.u32.totalorder %s562_s19, %s776_s0 }
  0x17   :  { %p568_p10 = pnand %p566_p9, %p563_p8 }
  0x19   :  { %571 = shalt.err (!%p568_p10)
}
  0x1a   :  { %s572_s24 = scalar_lea.vmem %s21_s16, 512  ;;  %p577_p12 = scmp.lt.s32.totalorder %s21_s16, %s21_s16 }
  0x1b   :  { %p573_p11 = scmp.ne.s32.totalorder %s21_s16, %s572_s24  ;;  %p578_p13 = scmp.lt.s32.totalorder %s572_s24, %s572_s24 }
  0x1d   :  { %p579_p0 = por %p578_p13, %p577_p12 }
  0x1f   :  { %p580_p1 = pnand %p579_p0, %p573_p11 }
  0x21   :  { %583 = shalt.err (!%p580_p1)
}
  0x22   :  { %s638_s3 = smov 128   ;;  %s639_s25 = smov 8  }
  0x23   :  { %26 = dma.hbm_to_vmem [thread:$0]  %s776_s0, 512, %s21_s16, [#allocation3], %s638_s3, %s638_s3, %s639_s25  }
  0x24   :  { %s640_s28 = smov [#allocation7]   ;;  %s584_s9 = scalar_lea.hbm %s781_s5, 1024 }
  0x25   :  { %s50_s29 = sshll.u32 %s640_s28, 4  ;;  %p585_p2 = scmp.ne.s32.totalorder %s781_s5, %s584_s9  ;;  %s51_s29 = int_to_ptr.vmem [resolvable:$true] %s50_s29 }
  0x26   :  { %p588_p3 = scmp.lt.u32.totalorder %s584_s9, %s781_s5 }
  0x28   :  { %p590_p4 = pnand %p588_p3, %p585_p2 }
  0x2a   :  { %593 = shalt.err (!%p590_p4)
}
  0x2b   :  { %s594_s17 = scalar_lea.vmem %s51_s29, 1024  ;;  %p599_p6 = scmp.lt.s32.totalorder %s51_s29, %s51_s29 }
  0x2c   :  { %p595_p5 = scmp.ne.s32.totalorder %s51_s29, %s594_s17  ;;  %p600_p7 = scmp.lt.s32.totalorder %s594_s17, %s594_s17 }
  0x2e   :  { %p601_p8 = por %p600_p7, %p599_p6 }
  0x30   :  { %p602_p9 = pnand %p601_p8, %p595_p5 }
  0x32   :  { %605 = shalt.err (!%p602_p9)
}
  0x33   :  { %56 = dma.hbm_to_vmem [thread:$0]  %s781_s5, 1024, %s51_s29, [#allocation6], %s635_s11, %s635_s11, %s636_s12  }
  0x34   :  { %628 = dma.done.wait [#allocation3], 512  }
  0x35   :  { %629 = vsyncadd [#allocation3], 4294966784 }
  0x36   :  { %630 = dma.done.wait [#allocation6], 2048  }
  0x37   :  { %631 = vsyncadd [#allocation6], 4294965248  ;;  %v523_v0 = vld [vmem:[%s777_s1] sm:$0xff]   ;;  %v732_v2 = vld [vmem:[#allocation2 + $0x8] sm:$0xff]  ;;  %vm90_vm0 = vcmask 130048  }
  0x38   :  { %v730_v1 = vld [vmem:[#allocation2] sm:$0xff]  ;;  %v734_v3 = vld [vmem:[#allocation2 + $0x10] sm:$0xff]  ;;  %469 = vmatprep.subr.bf16.mxu0 %v523_v0  ;;  %v738_v5 = vld [vmem:[#allocation2 + $0x18] sm:$0xff] }
  0x39   :  { %v73_v4 = vpack.c.bf16 %v732_v2, %v730_v1  ;;  %470 = vmatpush3.bf16.msra.mxu0 %v523_v0  ;;  %v74_v6 = vpack.c.bf16 %v738_v5, %v734_v3  ;;  %v524_v7 = vld [vmem:[#allocation5] sm:$0xff]   ;;  %v525_v8 = vld [vmem:[#allocation5 + $0x8] sm:$0xff]   ;;  %v526_v9 = vld [vmem:[#allocation5 + $0x10] sm:$0xff]  }
  0x3a   :  { %475 = vmatprep.subr.bf16.mxu1 %v524_v7  ;;  %v527_v10 = vld [vmem:[#allocation5 + $0x18] sm:$0xff]   ;;  %v528_v11 = vld [vmem:[#allocation5 + $0x20] sm:$0xff]   ;;  %v529_v12 = vld [vmem:[#allocation5 + $0x28] sm:$0xff]  }
  0x3b   :  { %471 = vmatprep.mubr.msk.bf16.mxu0 %vm90_vm0, %v73_v4  ;;  %476 = vmatpush3.bf16.msra.mxu1 %v524_v7  ;;  %v530_v13 = vld [vmem:[#allocation5 + $0x30] sm:$0xff]   ;;  %v531_v14 = vld [vmem:[#allocation5 + $0x38] sm:$0xff]   ;;  %v532_v15 = vld [vmem:[#allocation7] sm:$0xff]  }
  0x3c   :  { %472 = vmatmul.mubr.msk.bf16.vlgmr.msra.gmra.mrb[0].mxu0 %vm90_vm0, %v74_v6  ;;  %477 = vmatprep.subr.bf16.mxu1 %v525_v8  ;;  %v533_v16 = vld [vmem:[#allocation7 + $0x8] sm:$0xff]   ;;  %v534_v17 = vld [vmem:[#allocation7 + $0x10] sm:$0xff]   ;;  %v535_v18 = vld [vmem:[#allocation7 + $0x18] sm:$0xff]  }
  0x3d   :  { %495 = vmatprep.subr.bf16.mxu0 %v532_v15  ;;  %v536_v19 = vld [vmem:[#allocation7 + $0x20] sm:$0xff]   ;;  %v537_v20 = vld [vmem:[#allocation7 + $0x28] sm:$0xff]   ;;  %v538_v36 = vld [vmem:[#allocation7 + $0x30] sm:$0xff]  }
  0x3e   :  { %496 = vmatpush3.bf16.msra.mxu0 %v532_v15  ;;  %v424_v21 = vld [vmem:[%s778_s2] ss:$0 sm:$0xff]  ;;  %v539_v37 = vld [vmem:[#allocation7 + $0x38] sm:$0xff]  }
  0x3f   :  { %478 = vmatpush3.bf16.msra.mxu1 %v525_v8  ;;  %497 = vmatprep.subr.bf16.mxu0 %v533_v16  ;;  %v428_v38 = vld [vmem:[%s780_s4] ss:$0 sm:$0xff]  ;;  %s641_s4 = smov [#allocation8]  }
  0x40   :  { %479 = vmatprep.subr.bf16.mxu1 %v526_v9  ;;  %v437_v53 = vld [vmem:[%s782_s6] ss:$0 sm:$0xff]  ;;  %s411_s21 = sshll.u32 %s641_s4, 4  ;;  %s412_s21 = int_to_ptr.vmem [resolvable:$true] %s411_s21 }
  0x41   :  { %s606_s6 = scalar_lea.vmem %s412_s21, 512  ;;  %p611_p11 = scmp.lt.s32.totalorder %s412_s21, %s412_s21 }
  0x42   :  { %498 = vmatpush3.bf16.msra.mxu0 %v533_v16  ;;  %p607_p10 = scmp.ne.s32.totalorder %s412_s21, %s606_s6  ;;  %p612_p12 = scmp.lt.s32.totalorder %s606_s6, %s606_s6 }
  0x43   :  { %480 = vmatpush3.bf16.msra.mxu1 %v526_v9  ;;  %499 = vmatprep.subr.bf16.mxu0 %v534_v17 }
  0x44   :  { %481 = vmatprep.subr.bf16.mxu1 %v527_v10  ;;  %p613_p13 = por %p612_p12, %p611_p11 }
  0x46   :  { %500 = vmatpush3.bf16.msra.mxu0 %v534_v17  ;;  %p614_p0 = pnand %p613_p13, %p607_p10 }
  0x47   :  { %482 = vmatpush3.bf16.msra.mxu1 %v527_v10  ;;  %501 = vmatprep.subr.bf16.mxu0 %v535_v18 }
  0x48   :  { %483 = vmatprep.subr.bf16.mxu1 %v528_v11 }
  0x4a   :  { %502 = vmatpush3.bf16.msra.mxu0 %v535_v18 }
  0x4b   :  { %484 = vmatpush3.bf16.msra.mxu1 %v528_v11  ;;  %503 = vmatprep.subr.bf16.mxu0 %v536_v19 }
  0x4c   :  { %485 = vmatprep.subr.bf16.mxu1 %v529_v12 }
  0x4e   :  { %504 = vmatpush3.bf16.msra.mxu0 %v536_v19 }
  0x4f   :  { %486 = vmatpush3.bf16.msra.mxu1 %v529_v12  ;;  %505 = vmatprep.subr.bf16.mxu0 %v537_v20 }
  0x50   :  { %487 = vmatprep.subr.bf16.mxu1 %v530_v13 }
  0x52   :  { %506 = vmatpush3.bf16.msra.mxu0 %v537_v20 }
  0x53   :  { %488 = vmatpush3.bf16.msra.mxu1 %v530_v13  ;;  %507 = vmatprep.subr.bf16.mxu0 %v538_v36 }
  0x54   :  { %489 = vmatprep.subr.bf16.mxu1 %v531_v14 }
  0x56   :  { %508 = vmatpush3.bf16.msra.mxu0 %v538_v36 }
  0x57   :  { %490 = vmatpush3.bf16.msra.mxu1 %v531_v14  ;;  %509 = vmatprep.subr.bf16.mxu0 %v539_v37 }
  0x5a   :  { %510 = vmatpush3.bf16.msra.mxu0 %v539_v37 }
 0x10f   :  { %v473_v22 = vpop.f32.mrb[0].mxu0 }
 0x110   :  { %v140_v23 = vadd.f32 %v473_v22, %v424_v21  ;;  %v131_v24 = vpop.f32.mrb[1].mxu0 }
 0x111   :  { %v132_v25 = vadd.f32 %v424_v21, %v131_v24  ;;  %v474_v26 = vpop.f32.mrb[2].mxu0 }
 0x112   :  { %v143_v27 = vadd.f32 %v474_v26, %v424_v21  ;;  %v134_v28 = vpop.f32.mrb[3].mxu0  ;;  %v148_v30 = vmax.f32 %v140_v23, 0.0 }
 0x113   :  { %v135_v29 = vadd.f32 %v424_v21, %v134_v28  ;;  %v146_v32 = vmax.f32 %v132_v25, 0.0 }
 0x114   :  { %v149_v31 = vmax.f32 %v143_v27, 0.0 }
 0x115   :  { %v147_v33 = vmax.f32 %v135_v29, 0.0 }
 0x116   :  { %v151_v34 = vpack.c.bf16 %v149_v31, %v148_v30 }
 0x117   :  { %v150_v35 = vpack.c.bf16 %v147_v33, %v146_v32 }
 0x119   :  { %491 = vmatprep.mubr.bf16.mxu1 %v150_v35 }
 0x11a   :  { %492 = vmatmul.mubr.bf16.vlgmr.msra.gmra.mrb[0].mxu1 %v151_v34 }
 0x1ed   :  { %v493_v39 = vpop.f32.mrb[0].mxu1 }
 0x1ee   :  { %v266_v40 = vadd.f32 %v493_v39, %v428_v38  ;;  %v257_v41 = vpop.f32.mrb[1].mxu1 }
 0x1ef   :  { %v258_v42 = vadd.f32 %v428_v38, %v257_v41  ;;  %v494_v43 = vpop.f32.mrb[2].mxu1 }
 0x1f0   :  { %v269_v44 = vadd.f32 %v494_v43, %v428_v38  ;;  %v260_v45 = vpop.f32.mrb[3].mxu1  ;;  %v274_v47 = vmax.f32 %v266_v40, 0.0 }
 0x1f1   :  { %v261_v46 = vadd.f32 %v428_v38, %v260_v45  ;;  %v272_v49 = vmax.f32 %v258_v42, 0.0 }
 0x1f2   :  { %v275_v48 = vmax.f32 %v269_v44, 0.0 }
 0x1f3   :  { %v273_v50 = vmax.f32 %v261_v46, 0.0 }
 0x1f4   :  { %v277_v51 = vpack.c.bf16 %v275_v48, %v274_v47 }
 0x1f5   :  { %v276_v52 = vpack.c.bf16 %v273_v50, %v272_v49 }
 0x1f7   :  { %511 = vmatprep.mubr.bf16.mxu0 %v276_v52 }
 0x1f8   :  { %512 = vmatmul.mubr.bf16.vlgmr.msra.gmra.mrb[4].mxu0 %v277_v51 }
 0x2cb   :  { %v513_v54 = vpop.f32.mrb[4].mxu0 }
 0x2cc   :  { %v392_v55 = vadd.f32 %v513_v54, %v437_v53  ;;  %v383_v56 = vpop.f32.mrb[5].mxu0 }
 0x2cd   :  { %v384_v57 = vadd.f32 %v437_v53, %v383_v56  ;;  %v514_v58 = vpop.f32.mrb[6].mxu0 }
 0x2ce   :  { %v400_v59 = vadd.f32 %v392_v55, %v734_v3  ;;  %v395_v60 = vadd.f32 %v514_v58, %v437_v53  ;;  %v386_v61 = vpop.f32.mrb[7].mxu0 }
 0x2cf   :  { %v398_v62 = vadd.f32 %v384_v57, %v730_v1  ;;  %v387_v63 = vadd.f32 %v437_v53, %v386_v61 }
 0x2d0   :  { %404 = vst.msk [vmem:[#allocation8 + $0x10] sm:$0xff] %vm90_vm0, %v400_v59  ;;  %v401_v0 = vadd.f32 %v395_v60, %v738_v5 }
 0x2d1   :  { %402 = vst.msk [vmem:[#allocation8] sm:$0xff] %vm90_vm0, %v398_v62  ;;  %v399_v4 = vadd.f32 %v387_v63, %v732_v2 }
 0x2d2   :  { %405 = vst.msk [vmem:[#allocation8 + $0x18] sm:$0xff] %vm90_vm0, %v401_v0 }
 0x2d3   :  { %403 = vst.msk [vmem:[#allocation8 + $0x8] sm:$0xff] %vm90_vm0, %v399_v4 }
 0x2d4   :  { %617 = shalt.err (!%p614_p0)
}
 0x2d5   :  { %s618_s24 = scalar_lea.hbm %s783_s7, 512 }
 0x2d6   :  { %p619_p1 = scmp.ne.s32.totalorder %s783_s7, %s618_s24  ;;  %p622_p2 = scmp.lt.u32.totalorder %s618_s24, %s783_s7 }
 0x2d8   :  { %p624_p3 = pnand %p622_p2, %p619_p1 }
 0x2da   :  { %627 = shalt.err (!%p624_p3)
}
 0x2db   :  { %417 = dma.vmem_to_hbm [thread:$0]  %s412_s21, 512, %s783_s7, [#allocation4], %s638_s3, %s638_s3, %s639_s25  }
 0x2dc   :  { %632 = dma.done.wait [#allocation4], 512  }
 0x2dd   :  { %633 = vsyncadd [#allocation4], 4294966784 }
 0x2de   :  { %421 = vsyncpa [#allocation3], 1 }
 0x2df   :  { %422 = vsyncpa [#allocation6], 1 }
 0x2e0   :  { %423 = vsyncpa [#allocation4], 1 }

</bundles_post_ra>
